<compile_context>
chip_gen: v6e
topology: v6e:2x2x1
jax: 0.10.0
libtpu: 0.0.40
codegen_flags: <defaults>
</compile_context>

<pallas_src>
import functools

import jax
import jax.numpy as jnp
import numpy as np
from jax import lax
from jax.experimental import pallas as pl
from jax.experimental.pallas import tpu as pltpu


_MAX_TILE_ELEMS = 4096 * 128          # ~2 MiB per f32 input tile
_VMEM_LIMIT = 32 * 1024 * 1024


def _round_up(a, b):
    return ((a + b - 1) // b) * b


def _choose_block_rows(m_rows, lane_w):
    """8-aligned row-block: ~2 MiB tiles, single step for tiny inputs."""
    max_rows = max(8, (_MAX_TILE_ELEMS // lane_w) // 8 * 8)
    if m_rows < 8:
        return 8
    if m_rows <= 1024:                 # tiny input: don't pay 2x step overhead
        return min((m_rows // 8) * 8, max_rows)
    if m_rows < 2 * max_rows:          # two roughly even steps (2 TCs on v7x)
        return min(_round_up(-(-m_rows // 2), 8), max_rows)
    return max_rows


def _pick_precision(dtype):
    # Conscious choice (review): exact 3-pass f32 for f32 inputs, fast
    # default path for bf16/fp16 inputs.
    return lax.Precision.HIGHEST if dtype == jnp.float32 else lax.Precision.DEFAULT


# --------------------------- packed / narrow path (W <= 128) -----------------

def _build_seg_shift_matrix(tx, L, seg):
    """(L, L) block-diagonal matrix: L//seg copies of a seg-wide bilinear
    X-shift band.  out = x_packed @ S applies the shift independently inside
    each seg-wide segment (= one image row); zero padding at segment edges
    falls out automatically."""
    k_f = jnp.ceil(tx)
    frac = (k_f - tx).astype(jnp.float32)
    k = k_f.astype(jnp.int32)
    src = lax.broadcasted_iota(jnp.int32, (L, L), 0)
    dst = lax.broadcasted_iota(jnp.int32, (L, L), 1)
    same_seg = (src // seg) == (dst // seg)
    d = (dst % seg) - (src % seg)
    band = jnp.where(d == k, 1.0 - frac, 0.0) + jnp.where(d == k - 1, frac, 0.0)
    return jnp.where(same_seg, band, 0.0).astype(jnp.float32)


def _seg_kernel(x_ref, s_ref, o_ref, *, precision):
    # x_ref: (block_rows, L) packed pixel rows in x.dtype; s_ref resident f32.
    x = x_ref[...].astype(jnp.float32)
    y = lax.dot_general(x, s_ref[...], (((1,), (0,)), ((), ())),
                        precision=precision,
                        preferred_element_type=jnp.float32)
    o_ref[...] = y.astype(o_ref.dtype)


# ------------------------------ wide path (W > 128) --------------------------

def _build_wide_shift_mats(tx, qb):
    """(2, 128, 128) banded shift matrices.  For output column block jb the
    sources lie inside the two consecutive source blocks (jb-qb, jb-qb+1),
    where qb = ceil(k/128).  Window-local source position for output lane t is
    t+u (weight 1-frac) and t+u+1 (weight frac), with u = 128*qb - k in
    [0, 127]."""
    k_f = jnp.ceil(tx)
    frac = (k_f - tx).astype(jnp.float32)
    k = k_f.astype(jnp.int32)
    u = 128 * qb - k
    p = lax.broadcasted_iota(jnp.int32, (256, 128), 0)   # window source pos
    t = lax.broadcasted_iota(jnp.int32, (256, 128), 1)   # output lane
    w = (jnp.where(p == t + u, 1.0 - frac, 0.0)
         + jnp.where(p == t + u + 1, frac, 0.0))
    return w.reshape(2, 128, 128).astype(jnp.float32)


def _wide_kernel(qb_ref, x0_ref, x1_ref, s_ref, o_ref, *, nb, rem_w, precision):
    j = pl.program_id(1)
    qb = qb_ref[0]
    sb0 = j - qb                     # source column block of window half 0
    sb1 = sb0 + 1                    # source column block of window half 1
    x0 = x0_ref[...].astype(jnp.float32)
    x1 = x1_ref[...].astype(jnp.float32)
    if rem_w:
        # Zero lanes past W in the (Pallas-padded) last source column block so
        # unspecified padding cannot leak through the contraction.
        lane = lax.broadcasted_iota(jnp.int32, x0.shape, 1)
        x0 = jnp.where(jnp.logical_and(sb0 == nb - 1, lane >= rem_w), 0.0, x0)
        x1 = jnp.where(jnp.logical_and(sb1 == nb - 1, lane >= rem_w), 0.0, x1)
    dn = (((1,), (0,)), ((), ()))
    t0 = lax.dot_general(x0, s_ref[0], dn, precision=precision,
                         preferred_element_type=jnp.float32)
    t1 = lax.dot_general(x1, s_ref[1], dn, precision=precision,
                         preferred_element_type=jnp.float32)
    v0 = jnp.logical_and(sb0 >= 0, sb0 <= nb - 1)   # out-of-range block -> 0
    v1 = jnp.logical_and(sb1 >= 0, sb1 <= nb - 1)
    acc = jnp.where(v0, t0, 0.0) + jnp.where(v1, t1, 0.0)
    o_ref[...] = acc.astype(o_ref.dtype)


# --------------------------------- wrapper -----------------------------------

def translate_x(x, trans_param):
    """x: (N, C, H, W); trans_param: (1,) learnable tx.  Forward of kTranslateX."""
    N, C, H, W = x.shape
    rows = N * C * H
    tx = trans_param[0]
    precision = _pick_precision(x.dtype)

    if W <= 128:
        # Packed / narrow path: pack L//W image rows per lane-row when possible.
        L = W                                     # narrow fallback (full-dim block)
        for m in (1, 2, 3):
            if (128 * m) % W == 0:
                L = 128 * m
                break
        total = rows * W
        if total % L == 0:
            m_rows = total // L
            x2d = x.reshape(m_rows, L)            # pure reshape, no padded copy
            pad_tail = 0
        else:
            # Rare ragged case (rows not a multiple of L//W): pays one pad copy.
            m_rows = -(-total // L)
            pad_tail = m_rows * L - total
            x2d = jnp.pad(x.reshape(total), (0, pad_tail)).reshape(m_rows, L)

        S = _build_seg_shift_matrix(tx, L, W)
        block_rows = _choose_block_rows(m_rows, L)
        grid = (pl.cdiv(m_rows, block_rows),)

        out2d = pl.pallas_call(
            functools.partial(_seg_kernel, precision=precision),
            out_shape=jax.ShapeDtypeStruct((m_rows, L), x.dtype),
            grid=grid,
            in_specs=[
                pl.BlockSpec((block_rows, L), lambda i: (i, 0)),   # streamed tiles
                pl.BlockSpec((L, L), lambda i: (0, 0)),            # resident S
            ],
            out_specs=pl.BlockSpec((block_rows, L), lambda i: (i, 0)),
            compiler_params=pltpu.CompilerParams(
                dimension_semantics=("parallel",),
                vmem_limit_bytes=_VMEM_LIMIT),
        )(x2d, S)

        if pad_tail:
            return out2d.reshape(-1)[:total].reshape(N, C, H, W)
        return out2d.reshape(N, C, H, W)

    # Wide path (W > 128): banded, column-blocked matmul; FLOPs per output
    # element are bounded (2 x 128-wide contractions) independent of W.
    nb = pl.cdiv(W, 128)
    rem_w = W % 128
    x2d = x.reshape(rows, W)                      # pure reshape, no copy
    k = jnp.ceil(tx).astype(jnp.int32)
    qb = -jnp.floor_divide(-k, 128)               # ceil(k / 128)
    qb_arr = qb.reshape(1).astype(jnp.int32)
    SW = _build_wide_shift_mats(tx, qb)

    block_rows = _choose_block_rows(rows, 128)
    grid = (pl.cdiv(rows, block_rows), nb)

    out2d = pl.pallas_call(
        functools.partial(_wide_kernel, nb=nb, rem_w=rem_w, precision=precision),
        out_shape=jax.ShapeDtypeStruct((rows, W), x.dtype),
        grid_spec=pltpu.PrefetchScalarGridSpec(
            num_scalar_prefetch=1,
            grid=grid,
            in_specs=[
                pl.BlockSpec(
                    (block_rows, 128),
                    lambda i, j, q: (i, jnp.minimum(jnp.maximum(j - q[0], 0),
                                                    nb - 1))),
                pl.BlockSpec(
                    (block_rows, 128),
                    lambda i, j, q: (i, jnp.minimum(jnp.maximum(j - q[0] + 1, 0),
                                                    nb - 1))),
                pl.BlockSpec((2, 128, 128), lambda i, j, q: (0, 0, 0)),  # resident S
            ],
            out_specs=pl.BlockSpec((block_rows, 128), lambda i, j, q: (i, j)),
        ),
        compiler_params=pltpu.CompilerParams(
            dimension_semantics=("parallel", "parallel"),
            vmem_limit_bytes=_VMEM_LIMIT),
    )(qb_arr, x2d, x2d, SW)

    return out2d.reshape(N, C, H, W)


# ----------------------------------- test ------------------------------------

if __name__ == "__main__":
    key = jax.random.PRNGKey(0)

    def reference(xn, tx):
        k = int(np.ceil(tx))
        frac = k - tx

        def shift_right(a, s):
            r = np.zeros_like(a)
            if s > 0:
                if s < a.shape[-1]:
                    r[..., s:] = a[..., :-s]
            elif s < 0:
                if -s < a.shape[-1]:
                    r[..., :s] = a[..., -s:]
            else:
                r = a.copy()
            return r

        return (1.0 - frac) * shift_right(xn, k) + frac * shift_right(xn, k - 1)

    translate_x_jit = jax.jit(translate_x)

    # Test 1: packed path (W = 16 divides 128), positive fractional shift.
    k1, k2 = jax.random.split(key)
    x1 = jax.random.normal(k1, (2, 4, 16, 16), dtype=jnp.float32)
    p1 = jnp.array([2.5], dtype=jnp.float32)
    out1 = jax.block_until_ready(translate_x_jit(x1, p1))
    ref1 = reference(np.asarray(x1), 2.5)
    assert np.allclose(np.asarray(out1), ref1, atol=1e-5), "packed path mismatch"

    # Test 2: wide banded path (W = 256 > 128), negative fractional shift.
    x2 = jax.random.normal(k2, (1, 2, 8, 256), dtype=jnp.float32)
    p2 = jnp.array([-3.25], dtype=jnp.float32)
    out2 = jax.block_until_ready(translate_x_jit(x2, p2))
    ref2 = reference(np.asarray(x2), -3.25)
    assert np.allclose(np.asarray(out2), ref2, atol=1e-5), "wide path mismatch"

    print("KERNEL_OK")
</pallas_src>

<mosaic_0001>
module attributes {stable_mosaic.version = 11 : i64} {
  func.func @_seg_kernel(%arg0: i32, %arg1: memref<16x128xf32, #tpu.memory_space<vmem>>, %arg2: memref<128x128xf32, #tpu.memory_space<vmem>>, %arg3: memref<16x128xf32, #tpu.memory_space<vmem>>) attributes {dimension_semantics = [#tpu.dimension_semantics<parallel>], iteration_bounds = array<i64: 1>, scalar_prefetch = 0 : i64, scratch_operands = 0 : i64, tpu.core_type = #tpu.core_type<tc>, window_params = [{transform_indices = @transform_0, window_bounds = array<i64: 16, 128>}, {pipeline_mode = #tpu.pipeline_mode<synchronous>, transform_indices = @transform_1, window_bounds = array<i64: 128, 128>}, {transform_indices = @transform_2, window_bounds = array<i64: 16, 128>}]} {
    %c0 = arith.constant 0 : index
    %c0_0 = arith.constant 0 : index
    %0 = vector.load %arg1[%c0, %c0_0] : memref<16x128xf32, #tpu.memory_space<vmem>>, vector<16x128xf32>
    %c0_1 = arith.constant 0 : index
    %c0_2 = arith.constant 0 : index
    %1 = vector.load %arg2[%c0_1, %c0_2] : memref<128x128xf32, #tpu.memory_space<vmem>>, vector<128x128xf32>
    %cst = arith.constant dense<0.000000e+00> : vector<16x128xf32>
    %2 = tpu.matmul %0, %1, %cst {dimension_numbers = #tpu.dot_dimension_numbers<[1], [0], [0], [1], [0, 0, 1, 1], [], []>, precision = #tpu.contract_precision<fp32>} : vector<16x128xf32>, vector<128x128xf32>, vector<16x128xf32> -> vector<16x128xf32>
    %c0_3 = arith.constant 0 : index
    %c0_4 = arith.constant 0 : index
    %3 = vector.load %arg3[%c0_3, %c0_4] : memref<16x128xf32, #tpu.memory_space<vmem>>, vector<16x128xf32>
    tpu.vector_store %arg3[%c0_3, %c0_4], %2 {strides = array<i32>} : memref<16x128xf32, #tpu.memory_space<vmem>>, vector<16x128xf32>,
    return
  }
  func.func @transform_0(%arg0: i32) -> (i32, i32) {
    %c0_i32 = arith.constant 0 : i32
    %c0_i32_0 = arith.constant 0 : i32
    return %arg0, %c0_i32 : i32, i32
  }
  func.func @transform_1(%arg0: i32) -> (i32, i32) {
    %c0_i32 = arith.constant 0 : i32
    %c0_i32_0 = arith.constant 0 : i32
    %c0_i32_1 = arith.constant 0 : i32
    return %c0_i32, %c0_i32_0 : i32, i32
  }
  func.func @transform_2(%arg0: i32) -> (i32, i32) {
    %c0_i32 = arith.constant 0 : i32
    %c0_i32_0 = arith.constant 0 : i32
    return %arg0, %c0_i32 : i32, i32
  }
}

</mosaic_0001>

<bundles_post_ra>
// kernel: translate_x.1
= control target key start
LH: loop header
LB: loop body
LE: loop exit
PB: predicated region body
PF: predicated region fallthrough
CT: control target
= control target key end

     0   :  { %s1462_s1 = inlined_call_operand.vmem [shape: f32[128,128], index: 1, kind: input, shape index: {}]   ;;  %s1463_s0 = inlined_call_operand.vmem [shape: f32[16,128], index: 0, kind: input, shape index: {}]   ;;  %s1464_s2 = inlined_call_operand.vmem [shape: f32[16,128], index: 2, kind: output, shape index: {}]  }
   0x1   :  { %v28_v0 = vld [vmem:[%s1462_s1 + $0x78] sm:$0xff]  ;;  %v27_v1 = vld [vmem:[%s1462_s1 + $0x70] sm:$0xff]  ;;  %v26_v2 = vld [vmem:[%s1462_s1 + $0x68] sm:$0xff] }
   0x2   :  { %v1061_v3 = vand.u32 4294901760, %v28_v0  ;;  %v1063_v4 = vand.u32 4294901760, %v27_v1  ;;  %v1065_v5 = vand.u32 4294901760, %v26_v2  ;;  %v25_v6 = vld [vmem:[%s1462_s1 + $0x60] sm:$0xff]  ;;  %v24_v7 = vld [vmem:[%s1462_s1 + $0x58] sm:$0xff]  ;;  %v23_v8 = vld [vmem:[%s1462_s1 + $0x50] sm:$0xff] }
   0x3   :  { %v1076_v9 = vand.u32 4294901760, %v25_v6  ;;  %v1078_v10 = vand.u32 4294901760, %v24_v7  ;;  %v1080_v11 = vand.u32 4294901760, %v23_v8  ;;  %v22_v12 = vld [vmem:[%s1462_s1 + $0x48] sm:$0xff]  ;;  %v21_v13 = vld [vmem:[%s1462_s1 + $0x40] sm:$0xff]  ;;  %v20_v18 = vld [vmem:[%s1462_s1 + $0x38] sm:$0xff] }
   0x4   :  { %827 = vmatprep.subr.mxu0 %v1061_v3  ;;  %v1090_v14 = vsub.f32 %v28_v0, %v1061_v3  ;;  %v1093_v15 = vsub.f32 %v27_v1, %v1063_v4  ;;  %v1095_v16 = vand.u32 4294901760, %v22_v12  ;;  %v1098_v17 = vsub.f32 %v26_v2, %v1065_v5  ;;  %v19_v25 = vld [vmem:[%s1462_s1 + $0x30] sm:$0xff]  ;;  %v18_v35 = vld [vmem:[%s1462_s1 + $0x28] sm:$0xff]  ;;  %v17_v40 = vld [vmem:[%s1462_s1 + $0x20] sm:$0xff] }
   0x5   :  { %828 = vmatpush3.msra.mxu0 %v1061_v3  ;;  %v1105_v19 = vsub.f32 %v25_v6, %v1076_v9  ;;  %v1108_v20 = vsub.f32 %v24_v7, %v1078_v10  ;;  %v1120_v24 = vand.u32 4294901760, %v21_v13  ;;  %v1129_v27 = vand.u32 4294901760, %v20_v18  ;;  %v16_v48 = vld [vmem:[%s1462_s1 + $0x18] sm:$0xff]  ;;  %v11_v49 = vld [vmem:[%s1463_s0] sm:$0xff]  ;;  %v12_v54 = vld [vmem:[%s1463_s0 + $0x8] sm:$0xff] }
   0x6   :  { %829 = vmatprep.subr.mxu0 %v1063_v4  ;;  %v1112_v21 = vand.u32 4294901760, %v1090_v14  ;;  %v1115_v22 = vand.u32 4294901760, %v1093_v15  ;;  %v1118_v23 = vand.u32 4294901760, %v1098_v17  ;;  %v1135_v29 = vsub.f32 %v23_v8, %v1080_v11  ;;  %v15_v59 = vld [vmem:[%s1462_s1 + $0x10] sm:$0xff]  ;;  %v14_v2 = vld [vmem:[%s1462_s1 + $0x8] sm:$0xff] }
   0x7   :  { %830 = vmatpush3.msra.mxu0 %v1063_v4  ;;  %v1127_v26 = vand.u32 4294901760, %v1105_v19  ;;  %v1132_v28 = vand.u32 4294901760, %v1108_v20  ;;  %v1145_v33 = vsub.f32 %v22_v12, %v1095_v16  ;;  %v1148_v34 = vand.u32 4294901760, %v19_v25 }
   0x8   :  { %831 = vmatprep.subr.mxu0 %v1065_v5  ;;  %v134_v30 = vsub.f32 %v1090_v14, %v1112_v21  ;;  %v141_v31 = vsub.f32 %v1093_v15, %v1115_v22  ;;  %v148_v32 = vsub.f32 %v1098_v17, %v1118_v23  ;;  %v1157_v39 = vand.u32 4294901760, %v1135_v29 }
   0x9   :  { %832 = vmatpush3.msra.mxu0 %v1065_v5  ;;  %v155_v38 = vsub.f32 %v1105_v19, %v1127_v26  ;;  %v162_v41 = vsub.f32 %v1108_v20, %v1132_v28  ;;  %v1166_v42 = vand.u32 4294901760, %v1145_v33  ;;  %v1169_v43 = vsub.f32 %v21_v13, %v1120_v24 }
   0xa   :  { %833 = vmatprep.subr.mxu0 %v1076_v9  ;;  %v135_v36 = vand.u32 4294901760, %v134_v30  ;;  %v142_v37 = vand.u32 4294901760, %v141_v31  ;;  %v149_v44 = vand.u32 4294901760, %v148_v32  ;;  %v1172_v45 = vand.u32 4294901760, %v18_v35 }
   0xb   :  { %834 = vmatpush3.msra.mxu0 %v1076_v9  ;;  %v1175_v46 = vsub.f32 %v20_v18, %v1129_v27  ;;  %v1178_v47 = vand.u32 4294901760, %v17_v40  ;;  %v156_v50 = vand.u32 4294901760, %v155_v38  ;;  %v169_v51 = vsub.f32 %v1135_v29, %v1157_v39  ;;  %v13_v18 = vld [vmem:[%s1462_s1] sm:$0xff] }
   0xc   :  { %835 = vmatprep.subr.mxu0 %v1078_v10  ;;  %862 = vmatprep.subr.mxu1 %v135_v36  ;;  %v1190_v52 = vand.u32 4294901760, %v1169_v43  ;;  %v1193_v53 = vsub.f32 %v19_v25, %v1148_v34  ;;  %v163_v55 = vand.u32 4294901760, %v162_v41  ;;  %v176_v56 = vsub.f32 %v1145_v33, %v1166_v42 }
   0xd   :  { %836 = vmatpush3.msra.mxu0 %v1078_v10  ;;  %863 = vmatpush3.msra.mxu1 %v135_v36  ;;  %v1202_v57 = vand.u32 4294901760, %v16_v48  ;;  %v1205_v58 = vand.u32 4294901760, %v1175_v46  ;;  %v1211_v60 = vsub.f32 %v18_v35, %v1172_v45  ;;  %v1213_v61 = vand.u32 4294901760, %v11_v49 }
   0xe   :  { %837 = vmatprep.subr.mxu0 %v1080_v11  ;;  %864 = vmatprep.subr.mxu1 %v142_v37  ;;  %v1216_v62 = vand.u32 4294901760, %v12_v54  ;;  %v170_v63 = vand.u32 4294901760, %v169_v51  ;;  %v183_v0 = vsub.f32 %v1169_v43, %v1190_v52  ;;  %v1222_v1 = vand.u32 4294901760, %v1193_v53 }
   0xf   :  { %838 = vmatpush3.msra.mxu0 %v1080_v11  ;;  %865 = vmatpush3.msra.mxu1 %v142_v37  ;;  %v1228_v6 = vsub.f32 %v17_v40, %v1178_v47  ;;  %v177_v7 = vand.u32 4294901760, %v176_v56  ;;  %v1231_v8 = vand.u32 4294901760, %v15_v59  ;;  %v190_v12 = vsub.f32 %v1175_v46, %v1205_v58 }
  0x10   :  { %839 = vmatprep.subr.mxu0 %v1095_v16  ;;  %866 = vmatprep.subr.mxu1 %v149_v44  ;;  %v1237_v13 = vand.u32 4294901760, %v1211_v60  ;;  %v1243_v25 = vsub.f32 %v11_v49, %v1213_v61  ;;  %v1246_v30 = vsub.f32 %v16_v48, %v1202_v57  ;;  %v1249_v31 = vand.u32 4294901760, %v14_v2 }
  0x11   :  { %840 = vmatpush3.msra.mxu0 %v1095_v16  ;;  %867 = vmatpush3.msra.mxu1 %v149_v44  ;;  %v1252_v32 = vsub.f32 %v12_v54, %v1216_v62  ;;  %v184_v35 = vand.u32 4294901760, %v183_v0  ;;  %v197_v36 = vsub.f32 %v1193_v53, %v1222_v1  ;;  %v1258_v37 = vand.u32 4294901760, %v1228_v6 }
  0x12   :  { %841 = vmatprep.subr.mxu0 %v1120_v24  ;;  %868 = vmatprep.subr.mxu1 %v156_v50  ;;  %v1261_v38 = vand.u32 4294901760, %v13_v18  ;;  %v1264_v40 = vsub.f32 %v15_v59, %v1231_v8  ;;  %v191_v41 = vand.u32 4294901760, %v190_v12  ;;  %v204_v44 = vsub.f32 %v1211_v60, %v1237_v13 }
  0x13   :  { %842 = vmatpush3.msra.mxu0 %v1120_v24  ;;  %869 = vmatpush3.msra.mxu1 %v156_v50  ;;  %v1466_v48 = vand.u32 4294901760, %v1243_v25  ;;  %v1271_v49 = vand.u32 4294901760, %v1246_v30  ;;  %v1465_v50 = vand.u32 4294901760, %v1252_v32  ;;  %v1276_v51 = vsub.f32 %v14_v2, %v1249_v31 }
  0x14   :  { %843 = vmatprep.subr.mxu0 %v1129_v27  ;;  %870 = vmatprep.subr.mxu1 %v163_v55  ;;  %v198_v54 = vand.u32 4294901760, %v197_v36  ;;  %v1283_v56 = vand.u32 4294901760, %v1264_v40  ;;  %v1286_v59 = vsub.f32 %v13_v18, %v1261_v38 }
  0x15   :  { %844 = vmatpush3.msra.mxu0 %v1129_v27  ;;  %871 = vmatpush3.msra.mxu1 %v163_v55  ;;  %v211_v55 = vsub.f32 %v1228_v6, %v1258_v37  ;;  %v113_v0 = vsub.f32 %v1243_v25, %v1466_v48  ;;  %v218_v2 = vsub.f32 %v1246_v30, %v1271_v49  ;;  %v1299_v12 = vand.u32 4294901760, %v1276_v51 }
  0x16   :  { %845 = vmatprep.subr.mxu0 %v1148_v34  ;;  %872 = vmatprep.subr.mxu1 %v170_v63  ;;  %v1306_v36 = vand.u32 4294901760, %v1286_v59 }
  0x17   :  { %846 = vmatpush3.msra.mxu0 %v1148_v34  ;;  %873 = vmatpush3.msra.mxu1 %v170_v63  ;;  %v205_v63 = vand.u32 4294901760, %v204_v44  ;;  %v212_v18 = vand.u32 4294901760, %v211_v55  ;;  %v219_v44 = vand.u32 4294901760, %v218_v2  ;;  %v232_v55 = vsub.f32 %v1276_v51, %v1299_v12 }
  0x18   :  { %847 = vmatprep.subr.mxu0 %v1172_v45  ;;  %874 = vmatprep.subr.mxu1 %v177_v7  ;;  %v239_v48 = vsub.f32 %v1286_v59, %v1306_v36 }
  0x19   :  { %848 = vmatpush3.msra.mxu0 %v1172_v45  ;;  %875 = vmatpush3.msra.mxu1 %v177_v7  ;;  %v123_v7 = vsub.f32 %v1252_v32, %v1465_v50 }
  0x1a   :  { %849 = vmatprep.subr.mxu0 %v1178_v47  ;;  %876 = vmatprep.subr.mxu1 %v184_v35 }
  0x1b   :  { %850 = vmatpush3.msra.mxu0 %v1178_v47  ;;  %877 = vmatpush3.msra.mxu1 %v184_v35  ;;  %v225_v35 = vsub.f32 %v1264_v40, %v1283_v56  ;;  %v124_v50 = vand.u32 4294901760, %v123_v7 }
  0x1c   :  { %851 = vmatprep.subr.mxu0 %v1202_v57  ;;  %878 = vmatprep.subr.mxu1 %v191_v41 }
  0x1d   :  { %852 = vmatpush3.msra.mxu0 %v1202_v57  ;;  %879 = vmatpush3.msra.mxu1 %v191_v41  ;;  %v114_v41 = vand.u32 4294901760, %v113_v0  ;;  %v240_v0 = vand.u32 4294901760, %v239_v48 }
  0x1e   :  { %853 = vmatprep.subr.mxu0 %v1231_v8  ;;  %880 = vmatprep.subr.mxu1 %v198_v54 }
  0x1f   :  { %854 = vmatpush3.msra.mxu0 %v1231_v8  ;;  %881 = vmatpush3.msra.mxu1 %v198_v54  ;;  %v226_v54 = vand.u32 4294901760, %v225_v35 }
  0x20   :  { %855 = vmatprep.subr.mxu0 %v1249_v31  ;;  %882 = vmatprep.subr.mxu1 %v205_v63 }
  0x21   :  { %856 = vmatpush3.msra.mxu0 %v1249_v31  ;;  %883 = vmatpush3.msra.mxu1 %v205_v63  ;;  %v233_v63 = vand.u32 4294901760, %v232_v55 }
  0x22   :  { %857 = vmatprep.subr.mxu0 %v1261_v38  ;;  %884 = vmatprep.subr.mxu1 %v212_v18 }
  0x23   :  { %858 = vmatpush3.msra.mxu0 %v1261_v38  ;;  %885 = vmatpush3.msra.mxu1 %v212_v18 }
  0x24   :  { %859 = vmatprep.mubr.f32.mxu0 %v114_v41  ;;  %886 = vmatprep.subr.mxu1 %v219_v44 }
  0x25   :  { %897 = vmatprep.subr.mxu0 %v1090_v14  ;;  %860 = vmatmul.mubr.f32.vlgmr.msra.gmra.mxu0 %v124_v50 }
  0x26   :  { %887 = vmatpush3.msra.mxu1 %v219_v44  ;;  %898 = vmatpush3.msra.mxu0 %v1090_v14  ;;  %v1467_v14 = vand.u32 4294901760, %v1243_v25 }
  0x27   :  { %888 = vmatprep.subr.mxu1 %v226_v54  ;;  %899 = vmatprep.subr.mxu0 %v1093_v15 }
  0x28   :  { %889 = vmatpush3.msra.mxu1 %v226_v54  ;;  %900 = vmatpush3.msra.mxu0 %v1093_v15  ;;  %v1468_v15 = vand.u32 4294901760, %v1252_v32 }
  0x29   :  { %890 = vmatprep.subr.mxu1 %v233_v63  ;;  %901 = vmatprep.subr.mxu0 %v1098_v17 }
  0x2a   :  { %891 = vmatpush3.msra.mxu1 %v233_v63  ;;  %902 = vmatpush3.msra.mxu0 %v1098_v17 }
  0x2b   :  { %892 = vmatprep.subr.mxu1 %v240_v0  ;;  %903 = vmatprep.subr.mxu0 %v1105_v19 }
  0x2c   :  { %893 = vmatpush3.msra.mxu1 %v240_v0  ;;  %894 = vmatprep.mubr.f32.mxu1 %v1213_v61 }
  0x2d   :  { %904 = vmatpush3.msra.mxu0 %v1105_v19  ;;  %895 = vmatmul.mubr.f32.vlgmr.msra.gmra.mxu1 %v1216_v62 }
  0x2e   :  { %905 = vmatprep.subr.mxu0 %v1108_v20  ;;  %932 = vmatprep.subr.mxu1 %v1061_v3 }
  0x2f   :  { %906 = vmatpush3.msra.mxu0 %v1108_v20  ;;  %933 = vmatpush3.msra.mxu1 %v1061_v3 }
  0x30   :  { %907 = vmatprep.subr.mxu0 %v1135_v29  ;;  %934 = vmatprep.subr.mxu1 %v1063_v4 }
  0x31   :  { %908 = vmatpush3.msra.mxu0 %v1135_v29  ;;  %935 = vmatpush3.msra.mxu1 %v1063_v4 }
  0x32   :  { %909 = vmatprep.subr.mxu0 %v1145_v33  ;;  %936 = vmatprep.subr.mxu1 %v1065_v5 }
  0x33   :  { %910 = vmatpush3.msra.mxu0 %v1145_v33  ;;  %937 = vmatpush3.msra.mxu1 %v1065_v5 }
  0x34   :  { %911 = vmatprep.subr.mxu0 %v1169_v43  ;;  %938 = vmatprep.subr.mxu1 %v1076_v9 }
  0x35   :  { %912 = vmatpush3.msra.mxu0 %v1169_v43  ;;  %939 = vmatpush3.msra.mxu1 %v1076_v9 }
  0x36   :  { %913 = vmatprep.subr.mxu0 %v1175_v46  ;;  %940 = vmatprep.subr.mxu1 %v1078_v10 }
  0x37   :  { %914 = vmatpush3.msra.mxu0 %v1175_v46  ;;  %941 = vmatpush3.msra.mxu1 %v1078_v10 }
  0x38   :  { %915 = vmatprep.subr.mxu0 %v1193_v53  ;;  %942 = vmatprep.subr.mxu1 %v1080_v11 }
  0x39   :  { %916 = vmatpush3.msra.mxu0 %v1193_v53  ;;  %943 = vmatpush3.msra.mxu1 %v1080_v11 }
  0x3a   :  { %917 = vmatprep.subr.mxu0 %v1211_v60  ;;  %944 = vmatprep.subr.mxu1 %v1095_v16 }
  0x3b   :  { %918 = vmatpush3.msra.mxu0 %v1211_v60  ;;  %945 = vmatpush3.msra.mxu1 %v1095_v16 }
  0x3c   :  { %919 = vmatprep.subr.mxu0 %v1228_v6  ;;  %946 = vmatprep.subr.mxu1 %v1120_v24 }
  0x3d   :  { %920 = vmatpush3.msra.mxu0 %v1228_v6  ;;  %947 = vmatpush3.msra.mxu1 %v1120_v24 }
  0x3e   :  { %921 = vmatprep.subr.mxu0 %v1246_v30  ;;  %948 = vmatprep.subr.mxu1 %v1129_v27 }
  0x3f   :  { %922 = vmatpush3.msra.mxu0 %v1246_v30  ;;  %949 = vmatpush3.msra.mxu1 %v1129_v27 }
  0x40   :  { %923 = vmatprep.subr.mxu0 %v1264_v40  ;;  %950 = vmatprep.subr.mxu1 %v1148_v34 }
  0x41   :  { %924 = vmatpush3.msra.mxu0 %v1264_v40  ;;  %951 = vmatpush3.msra.mxu1 %v1148_v34 }
  0x42   :  { %925 = vmatprep.subr.mxu0 %v1276_v51  ;;  %952 = vmatprep.subr.mxu1 %v1172_v45 }
  0x43   :  { %926 = vmatpush3.msra.mxu0 %v1276_v51  ;;  %953 = vmatpush3.msra.mxu1 %v1172_v45 }
  0x44   :  { %927 = vmatprep.subr.mxu0 %v1286_v59  ;;  %954 = vmatprep.subr.mxu1 %v1178_v47 }
  0x45   :  { %928 = vmatpush3.msra.mxu0 %v1286_v59  ;;  %929 = vmatprep.mubr.f32.mxu0 %v1243_v25 }
  0x46   :  { %955 = vmatpush3.msra.mxu1 %v1178_v47  ;;  %930 = vmatmul.mubr.f32.vlgmr.msra.gmra.mxu0 %v1252_v32 }
  0x47   :  { %956 = vmatprep.subr.mxu1 %v1202_v57  ;;  %967 = vmatprep.subr.mxu0 %v1112_v21 }
  0x48   :  { %957 = vmatpush3.msra.mxu1 %v1202_v57  ;;  %968 = vmatpush3.msra.mxu0 %v1112_v21 }
  0x49   :  { %958 = vmatprep.subr.mxu1 %v1231_v8  ;;  %969 = vmatprep.subr.mxu0 %v1115_v22 }
  0x4a   :  { %959 = vmatpush3.msra.mxu1 %v1231_v8  ;;  %970 = vmatpush3.msra.mxu0 %v1115_v22 }
  0x4b   :  { %960 = vmatprep.subr.mxu1 %v1249_v31  ;;  %971 = vmatprep.subr.mxu0 %v1118_v23 }
  0x4c   :  { %961 = vmatpush3.msra.mxu1 %v1249_v31  ;;  %972 = vmatpush3.msra.mxu0 %v1118_v23 }
  0x4d   :  { %962 = vmatprep.subr.mxu1 %v1261_v38  ;;  %973 = vmatprep.subr.mxu0 %v1127_v26 }
  0x4e   :  { %963 = vmatpush3.msra.mxu1 %v1261_v38  ;;  %964 = vmatprep.mubr.f32.mxu1 %v1467_v14 }
  0x4f   :  { %974 = vmatpush3.msra.mxu0 %v1127_v26  ;;  %965 = vmatmul.mubr.f32.vlgmr.msra.gmra.mxu1 %v1468_v15 }
  0x50   :  { %975 = vmatprep.subr.mxu0 %v1132_v28  ;;  %1002 = vmatprep.subr.mxu1 %v1061_v3 }
  0x51   :  { %976 = vmatpush3.msra.mxu0 %v1132_v28  ;;  %1003 = vmatpush3.msra.mxu1 %v1061_v3 }
  0x52   :  { %977 = vmatprep.subr.mxu0 %v1157_v39  ;;  %1004 = vmatprep.subr.mxu1 %v1063_v4 }
  0x53   :  { %978 = vmatpush3.msra.mxu0 %v1157_v39  ;;  %1005 = vmatpush3.msra.mxu1 %v1063_v4 }
  0x54   :  { %979 = vmatprep.subr.mxu0 %v1166_v42  ;;  %1006 = vmatprep.subr.mxu1 %v1065_v5 }
  0x55   :  { %980 = vmatpush3.msra.mxu0 %v1166_v42  ;;  %1007 = vmatpush3.msra.mxu1 %v1065_v5 }
  0x56   :  { %981 = vmatprep.subr.mxu0 %v1190_v52  ;;  %1008 = vmatprep.subr.mxu1 %v1076_v9 }
  0x57   :  { %982 = vmatpush3.msra.mxu0 %v1190_v52  ;;  %1009 = vmatpush3.msra.mxu1 %v1076_v9 }
  0x58   :  { %983 = vmatprep.subr.mxu0 %v1205_v58  ;;  %1010 = vmatprep.subr.mxu1 %v1078_v10 }
  0x59   :  { %984 = vmatpush3.msra.mxu0 %v1205_v58  ;;  %1011 = vmatpush3.msra.mxu1 %v1078_v10 }
  0x5a   :  { %985 = vmatprep.subr.mxu0 %v1222_v1  ;;  %1012 = vmatprep.subr.mxu1 %v1080_v11 }
  0x5b   :  { %986 = vmatpush3.msra.mxu0 %v1222_v1  ;;  %1013 = vmatpush3.msra.mxu1 %v1080_v11 }
  0x5c   :  { %987 = vmatprep.subr.mxu0 %v1237_v13  ;;  %1014 = vmatprep.subr.mxu1 %v1095_v16 }
  0x5d   :  { %988 = vmatpush3.msra.mxu0 %v1237_v13  ;;  %1015 = vmatpush3.msra.mxu1 %v1095_v16 }
  0x5e   :  { %989 = vmatprep.subr.mxu0 %v1258_v37  ;;  %1016 = vmatprep.subr.mxu1 %v1120_v24 }
  0x5f   :  { %990 = vmatpush3.msra.mxu0 %v1258_v37  ;;  %1017 = vmatpush3.msra.mxu1 %v1120_v24 }
  0x60   :  { %991 = vmatprep.subr.mxu0 %v1271_v49  ;;  %1018 = vmatprep.subr.mxu1 %v1129_v27 }
  0x61   :  { %992 = vmatpush3.msra.mxu0 %v1271_v49  ;;  %1019 = vmatpush3.msra.mxu1 %v1129_v27 }
  0x62   :  { %993 = vmatprep.subr.mxu0 %v1283_v56  ;;  %1020 = vmatprep.subr.mxu1 %v1148_v34 }
  0x63   :  { %994 = vmatpush3.msra.mxu0 %v1283_v56  ;;  %1021 = vmatpush3.msra.mxu1 %v1148_v34 }
  0x64   :  { %995 = vmatprep.subr.mxu0 %v1299_v12  ;;  %1022 = vmatprep.subr.mxu1 %v1172_v45 }
  0x65   :  { %996 = vmatpush3.msra.mxu0 %v1299_v12  ;;  %1023 = vmatpush3.msra.mxu1 %v1172_v45 }
  0x66   :  { %997 = vmatprep.subr.mxu0 %v1306_v36  ;;  %1024 = vmatprep.subr.mxu1 %v1178_v47 }
  0x67   :  { %998 = vmatpush3.msra.mxu0 %v1306_v36  ;;  %999 = vmatprep.mubr.f32.mxu0 %v1213_v61 }
  0x68   :  { %1025 = vmatpush3.msra.mxu1 %v1178_v47  ;;  %1000 = vmatmul.mubr.f32.vlgmr.msra.gmra.mxu0 %v1216_v62 }
  0x69   :  { %1026 = vmatprep.subr.mxu1 %v1202_v57  ;;  %1034 = vmatprep.mubr.f32.mxu1 %v1213_v61 }
  0x6a   :  { %1027 = vmatpush3.msra.mxu1 %v1202_v57 }
  0x6b   :  { %1028 = vmatprep.subr.mxu1 %v1231_v8 }
  0x6c   :  { %1029 = vmatpush3.msra.mxu1 %v1231_v8 }
  0x6d   :  { %1030 = vmatprep.subr.mxu1 %v1249_v31 }
  0x6e   :  { %1031 = vmatpush3.msra.mxu1 %v1249_v31 }
  0x6f   :  { %1032 = vmatprep.subr.mxu1 %v1261_v38 }
  0x70   :  { %1033 = vmatpush3.msra.mxu1 %v1261_v38 }
  0x71   :  { %1035 = vmatmul.mubr.f32.vlgmr.msra.gmra.mxu1 %v1216_v62 }
  0xe5   :  { %v861_v3 = vpop.f32.mrf.mxu0 }
  0xe7   :  { %v116_v4 = vpop.f32.mrf.mxu0 }
  0xed   :  { %v896_v5 = vpop.f32.mrf.mxu1 }
  0xee   :  { %v284_v17 = vadd.f32 %v896_v5, %v861_v3 }
  0xef   :  { %v277_v10 = vpop.f32.mrf.mxu1 }
  0xf0   :  { %v278_v20 = vadd.f32 %v277_v10, %v116_v4 }
 0x106   :  { %v931_v9 = vpop.f32.mrf.mxu0 }
 0x107   :  { %v395_v21 = vadd.f32 %v931_v9, %v284_v17 }
 0x108   :  { %v387_v11 = vpop.f32.mrf.mxu0 }
 0x109   :  { %v388_v23 = vadd.f32 %v387_v11, %v278_v20 }
 0x10f   :  { %v966_v16 = vpop.f32.mrf.mxu1 }
 0x110   :  { %v492_v24 = vadd.f32 %v966_v16, %v395_v21 }
 0x111   :  { %v483_v22 = vpop.f32.mrf.mxu1 }
 0x112   :  { %v484_v27 = vadd.f32 %v483_v22, %v388_v23 }
 0x128   :  { %v1001_v19 = vpop.f32.mrf.mxu0 }
 0x129   :  { %v617_v28 = vadd.f32 %v1001_v19, %v492_v24 }
 0x12a   :  { %v610_v26 = vpop.f32.mrf.mxu0 }
 0x12b   :  { %v611_v33 = vadd.f32 %v610_v26, %v484_v27 }
 0x131   :  { %v1036_v29 = vpop.f32.mrf.mxu1 }
 0x132   :  { %v710_v34 = vadd.f32 %v1036_v29, %v617_v28 }
 0x133   :  { %v703_v39 = vpop.f32.mrf.mxu1 }
 0x134   :  { %714 = vst [vmem:[%s1464_s2 + $0x8] sm:$0xff] %v710_v34  ;;  %v704_v42 = vadd.f32 %v703_v39, %v611_v33 }
 0x136   :  { %713 = vst [vmem:[%s1464_s2] sm:$0xff] %v704_v42 }

</bundles_post_ra>
